<compile_context>
chip_gen: v7x
topology: tpu7x:2x2x1
jax: 0.10.0
libtpu: 0.0.40
codegen_flags: <defaults>
</compile_context>

<pallas_src>
import functools
import math

import jax
import jax.numpy as jnp
from jax import lax
from jax.experimental import pallas as pl
from jax.experimental.pallas import tpu as pltpu

# Large finite mask value: exp(mask - m) underflows to exactly 0, and the online
# softmax rescale never sees -inf - -inf.
_MASK_VALUE = -0.7 * float(jnp.finfo(jnp.float32).max)


# -----------------------------------------------------------------------------
# Stage 1: fused per-head QKV projection (one MXU matmul per (b, row-tile, head)).
# -----------------------------------------------------------------------------
def _qkv_proj_kernel(x_ref, w_ref, q_ref, k_ref, v_ref, *, head_dim):
    """x_ref: (1, tt, D_in); w_ref: (1, D_in, 3*D_out) = [Wq^T*scale | Wk^T | Wv^T];
    q/k/v_ref: (1, 1, tt, D_out) head-major output blocks."""
    x = x_ref[0, :, :]                                            # (tt, D_in)
    w = w_ref[0, :, :]                                            # (D_in, 3*D_out)
    p = jnp.dot(x, w, preferred_element_type=jnp.float32)         # (tt, 3*D_out)
    q_ref[0, 0, :, :] = p[:, :head_dim].astype(q_ref.dtype)
    k_ref[0, 0, :, :] = p[:, head_dim:2 * head_dim].astype(k_ref.dtype)
    v_ref[0, 0, :, :] = p[:, 2 * head_dim:].astype(v_ref.dtype)


# -----------------------------------------------------------------------------
# Stage 2: flash-style causal attention, one (batch, head, q-tile) per acc sweep.
# -----------------------------------------------------------------------------
def _flash_head_kernel(q_ref, k_ref, v_ref, o_ref, acc_scr, m_scr, l_scr, *,
                       block_q, block_k, mask_value):
    """q_ref/o_ref: (1, 1, tq, D); k_ref/v_ref: (1, 1, tk, D).
    acc_scr: (tq, D) f32; m_scr/l_scr: (tq, 1) f32 online-softmax stats."""
    qi = pl.program_id(2)
    ki = pl.program_id(3)
    nk = pl.num_programs(3)

    @pl.when(ki == 0)
    def _init():
        m_scr[...] = jnp.full_like(m_scr, mask_value)
        l_scr[...] = jnp.zeros_like(l_scr)
        acc_scr[...] = jnp.zeros_like(acc_scr)

    # Skip kv tiles that lie entirely in the causal future of this q tile.
    @pl.when(ki * block_k <= qi * block_q + (block_q - 1))
    def _compute():
        q = q_ref[0, 0, :, :]                      # (tq, d), pre-scaled by 1/sqrt(d)
        k = k_ref[0, 0, :, :]                      # (tk, d)
        v = v_ref[0, 0, :, :]                      # (tk, d)

        s = lax.dot_general(q, k, (((1,), (1,)), ((), ())),
                            preferred_element_type=jnp.float32)   # (tq, tk)

        # Apply the causal mask only on blocks that straddle the diagonal;
        # fully-visible blocks skip the iota/compare/select VPU work entirely.
        def _apply_mask(scores):
            rows = qi * block_q + lax.broadcasted_iota(jnp.int32, scores.shape, 0)
            cols = ki * block_k + lax.broadcasted_iota(jnp.int32, scores.shape, 1)
            return jnp.where(cols > rows, mask_value, scores)

        s = lax.cond(ki * block_k + (block_k - 1) > qi * block_q,
                     _apply_mask, lambda scores: scores, s)

        m_prev = m_scr[...]                                       # (tq, 1)
        l_prev = l_scr[...]
        m_next = jnp.maximum(m_prev, jnp.max(s, axis=-1, keepdims=True))
        alpha = jnp.exp(m_prev - m_next)                          # (tq, 1)
        p = jnp.exp(s - m_next)                                   # (tq, tk)

        pv = jnp.dot(p.astype(v.dtype), v, preferred_element_type=jnp.float32)
        acc_scr[...] = alpha * acc_scr[...] + pv
        l_scr[...] = alpha * l_prev + jnp.sum(p, axis=-1, keepdims=True)
        m_scr[...] = m_next

    @pl.when(ki == nk - 1)
    def _finalize():
        # Exact normalization, written straight to the output block in one pass.
        o_ref[0, 0, :, :] = (acc_scr[...] / l_scr[...]).astype(o_ref.dtype)


# -----------------------------------------------------------------------------
# Wrapper
# -----------------------------------------------------------------------------
def _pick_tile(n, preferred):
    """Largest preferred (256/512-multiple friendly) tile dividing n, else full n.

    Falling back to the full extent keeps per-grid-step overhead amortized instead
    of dropping to tiny 8-wide tiles.
    TODO(synk): pad T to a multiple of 256 and mask the tail for large awkward T.
    """
    for cand in preferred:
        if cand <= n and n % cand == 0:
            return cand
    return n


def multi_head_attention_wrapper(x, wq, wk, wv, *, q_tile=None, kv_tile=None,
                                 row_tile=None):
    """x: (B, T, D_in); wq/wk/wv: (H, D_out, D_in) (nn.Linear layout, no bias).
    Returns (B, T, H*D_out) == torch.cat([head(x) for head in heads], dim=-1)."""
    b, t, d_in = x.shape
    heads, d_out, _ = wq.shape
    itemsize = jnp.dtype(x.dtype).itemsize

    # Fuse + pre-transpose per-head weights: (H, D_out, D_in) -> (H, D_in, 3*D_out),
    # columns = [Wq^T * 1/sqrt(d_out) | Wk^T | Wv^T].  Folding the softmax scale into
    # Wq means the (tq, tk) score tile never needs a VPU rescale.
    scale = 1.0 / math.sqrt(d_out)
    wqkv = jnp.concatenate(
        [jnp.transpose(wq, (0, 2, 1)) * scale,
         jnp.transpose(wk, (0, 2, 1)),
         jnp.transpose(wv, (0, 2, 1))], axis=-1).astype(x.dtype)

    # Generation-friendly tiles: tq prefers 256 (shrink tq before tk on v7x),
    # tk prefers 512/256 to keep MXU cadence full on v6e/v7x.
    tq = q_tile or _pick_tile(t, (256, 512, 128))
    tk = kv_tile or _pick_tile(t, (512, 256, 128))
    tt = row_tile or _pick_tile(t, (256, 512, 128))
    n_q, n_k, n_t = t // tq, t // tk, t // tt

    # ---------------- Stage 1: Q/K/V projection (run once) ----------------
    proj_vmem = 2 * itemsize * (tt * d_in + d_in * 3 * d_out + 3 * tt * d_out)
    proj_cost = pl.CostEstimate(
        flops=int(2 * b * t * d_in * 3 * heads * d_out),
        transcendentals=0,
        bytes_accessed=int(itemsize * (b * t * d_in
                                       + b * n_t * heads * d_in * 3 * d_out
                                       + 3 * b * heads * t * d_out)),
    )
    q, k, v = pl.pallas_call(
        functools.partial(_qkv_proj_kernel, head_dim=d_out),
        out_shape=tuple(jax.ShapeDtypeStruct((b, heads, t, d_out), x.dtype)
                        for _ in range(3)),
        grid_spec=pltpu.PrefetchScalarGridSpec(
            num_scalar_prefetch=0,
            # heads innermost: the x row tile's block index repeats across the head
            # sweep, so Pallas keeps it resident instead of re-fetching it H times.
            grid=(b, n_t, heads),
            in_specs=[
                pl.BlockSpec((1, tt, d_in), lambda bb, ti, hh: (bb, ti, 0)),
                pl.BlockSpec((1, d_in, 3 * d_out), lambda bb, ti, hh: (hh, 0, 0)),
            ],
            out_specs=[
                pl.BlockSpec((1, 1, tt, d_out), lambda bb, ti, hh: (bb, hh, ti, 0)),
                pl.BlockSpec((1, 1, tt, d_out), lambda bb, ti, hh: (bb, hh, ti, 0)),
                pl.BlockSpec((1, 1, tt, d_out), lambda bb, ti, hh: (bb, hh, ti, 0)),
            ],
        ),
        compiler_params=pltpu.CompilerParams(
            dimension_semantics=("parallel", "parallel", "parallel"),
            vmem_limit_bytes=int(min(64 * 2**20, max(32 * 2**20, 4 * proj_vmem))),
        ),
        cost_estimate=proj_cost,
    )(x, wqkv)

    # ---------------- Stage 2: flash attention per (batch, head) ----------------
    def _kv_block_index(ki, qi):
        # Clamp causally-skipped kv tiles to the last needed one so the block index
        # repeats and Pallas skips the DMA for those pipeline steps.
        return jnp.minimum(ki, (qi * tq + tq - 1) // tk)

    flash_vmem = (2 * itemsize * (2 * tq * d_out + 2 * tk * d_out)
                  + 4 * (tq * d_out + 2 * tq * 128))
    flash_cost = pl.CostEstimate(
        flops=int(2 * 2 * b * heads * t * t * d_out),
        transcendentals=int(b * heads * t * t),
        bytes_accessed=int(itemsize * b * heads * t * d_out * (3 + n_q)),
    )
    out_bhtd = pl.pallas_call(
        functools.partial(_flash_head_kernel, block_q=tq, block_k=tk,
                          mask_value=_MASK_VALUE),
        out_shape=jax.ShapeDtypeStruct((b, heads, t, d_out), x.dtype),
        grid_spec=pltpu.PrefetchScalarGridSpec(
            num_scalar_prefetch=0,
            grid=(b, heads, n_q, n_k),              # parallel axes first, kv last
            in_specs=[
                pl.BlockSpec((1, 1, tq, d_out),
                             lambda bb, hh, qi, ki: (bb, hh, qi, 0)),
                pl.BlockSpec((1, 1, tk, d_out),
                             lambda bb, hh, qi, ki: (bb, hh, _kv_block_index(ki, qi), 0)),
                pl.BlockSpec((1, 1, tk, d_out),
                             lambda bb, hh, qi, ki: (bb, hh, _kv_block_index(ki, qi), 0)),
            ],
            out_specs=pl.BlockSpec((1, 1, tq, d_out),
                                   lambda bb, hh, qi, ki: (bb, hh, qi, 0)),
            scratch_shapes=[
                pltpu.VMEM((tq, d_out), jnp.float32),   # online-softmax numerator
                pltpu.VMEM((tq, 1), jnp.float32),       # running row max
                pltpu.VMEM((tq, 1), jnp.float32),       # running row sum
            ],
        ),
        compiler_params=pltpu.CompilerParams(
            dimension_semantics=("parallel", "parallel", "parallel", "arbitrary"),
            vmem_limit_bytes=int(min(64 * 2**20, max(32 * 2**20, 4 * flash_vmem))),
        ),
        cost_estimate=flash_cost,
    )(q, k, v)

    # (B, H, T, D_out) -> (B, T, H*D_out): the torch.cat(..., dim=-1) head layout.
    # Pure layout work of output size; left to XLA (fusable with downstream ops).
    return out_bhtd.transpose(0, 2, 1, 3).reshape(b, t, heads * d_out)


# -----------------------------------------------------------------------------
# Pure-JAX reference replicating the PyTorch forward (eval mode, dropout=0).
# -----------------------------------------------------------------------------
def _reference(x, wq, wk, wv):
    outs = []
    t = x.shape[1]
    mask = jnp.triu(jnp.ones((t, t), dtype=bool), k=1)
    for i in range(wq.shape[0]):
        q = x @ wq[i].T
        k = x @ wk[i].T
        v = x @ wv[i].T
        scores = jnp.einsum("bqd,bkd->bqk", q, k)
        scores = jnp.where(mask[None], -jnp.inf, scores)
        attn = jax.nn.softmax(scores / math.sqrt(k.shape[-1]), axis=-1)
        outs.append(attn @ v)
    return jnp.concatenate(outs, axis=-1)


if __name__ == "__main__":
    # Shapes implied by the module's script: inputs is (6, 3), batch = (2, 6, 3),
    # context_length = 6.  Pick d_out=2, num_heads=2, dropout=0.0, qkv_bias=False.
    B, T, D_IN, D_OUT, H = 2, 6, 3, 2, 2

    inputs = jnp.array(
        [[0.43, 0.15, 0.89],
         [0.55, 0.87, 0.66],
         [0.57, 0.85, 0.64],
         [0.22, 0.58, 0.33],
         [0.77, 0.25, 0.10],
         [0.05, 0.80, 0.55]],
        dtype=jnp.float32,
    )
    x = jnp.stack((inputs, inputs), axis=0)  # (2, 6, 3)

    key = jax.random.PRNGKey(0)
    kq, kk, kv = jax.random.split(key, 3)
    # Deterministic synthetic weights, nn.Linear layout (D_out, D_in), per head.
    wq = jax.random.normal(kq, (H, D_OUT, D_IN), dtype=jnp.float32) * 0.5
    wk = jax.random.normal(kk, (H, D_OUT, D_IN), dtype=jnp.float32) * 0.5
    wv = jax.random.normal(kv, (H, D_OUT, D_IN), dtype=jnp.float32) * 0.5

    out = jax.block_until_ready(multi_head_attention_wrapper(x, wq, wk, wv))
    ref = jax.block_until_ready(_reference(x, wq, wk, wv))

    assert out.shape == (B, T, H * D_OUT), out.shape
    assert jnp.allclose(out, ref, atol=2e-5, rtol=2e-5), (
        f"max abs err = {jnp.max(jnp.abs(out - ref))}"
    )
    print("KERNEL_OK")
</pallas_src>

<mosaic_0001>
module attributes {stable_mosaic.version = 11 : i64} {
  func.func @_qkv_proj_kernel(%arg0: i32, %arg1: i32, %arg2: i32, %arg3: memref<1x6x3xf32, #tpu.memory_space<vmem>>, %arg4: memref<1x3x6xf32, #tpu.memory_space<vmem>>, %arg5: memref<1x1x6x2xf32, #tpu.memory_space<vmem>>, %arg6: memref<1x1x6x2xf32, #tpu.memory_space<vmem>>, %arg7: memref<1x1x6x2xf32, #tpu.memory_space<vmem>>) attributes {dimension_semantics = [#tpu.dimension_semantics<parallel>, #tpu.dimension_semantics<parallel>, #tpu.dimension_semantics<parallel>], iteration_bounds = array<i64: 2, 1, 2>, scalar_prefetch = 0 : i64, scratch_operands = 0 : i64, tpu.core_type = #tpu.core_type<tc>, window_params = [{transform_indices = @transform_0, window_bounds = array<i64: 1, 6, 3>}, {transform_indices = @transform_1, window_bounds = array<i64: 1, 3, 6>}, {transform_indices = @transform_2, window_bounds = array<i64: 1, 1, 6, 2>}, {transform_indices = @transform_3, window_bounds = array<i64: 1, 1, 6, 2>}, {transform_indices = @transform_4, window_bounds = array<i64: 1, 1, 6, 2>}]} {
    %c0 = arith.constant 0 : index
    %c0_0 = arith.constant 0 : index
    %c0_1 = arith.constant 0 : index
    %0 = vector.load %arg3[%c0, %c0_0, %c0_1] : memref<1x6x3xf32, #tpu.memory_space<vmem>>, vector<1x6x3xf32>
    %1 = vector.shape_cast %0 : vector<1x6x3xf32> to vector<6x3xf32>
    %c0_2 = arith.constant 0 : index
    %c0_3 = arith.constant 0 : index
    %c0_4 = arith.constant 0 : index
    %2 = vector.load %arg4[%c0_2, %c0_3, %c0_4] : memref<1x3x6xf32, #tpu.memory_space<vmem>>, vector<1x3x6xf32>
    %3 = vector.shape_cast %2 : vector<1x3x6xf32> to vector<3x6xf32>
    %cst = arith.constant dense<0.000000e+00> : vector<6x6xf32>
    %4 = tpu.matmul %1, %3, %cst {dimension_numbers = #tpu.dot_dimension_numbers<[1], [0], [0], [1], [0, 0, 1, 1], [], []>} : vector<6x3xf32>, vector<3x6xf32>, vector<6x6xf32> -> vector<6x6xf32>
    %5 = vector.extract_strided_slice %4 {offsets = [0, 0], sizes = [6, 2], strides = [1, 1]} : vector<6x6xf32> to vector<6x2xf32>
    %c0_5 = arith.constant 0 : index
    %c0_6 = arith.constant 0 : index
    %c0_7 = arith.constant 0 : index
    %c0_8 = arith.constant 0 : index
    %6 = vector.load %arg5[%c0_5, %c0_6, %c0_7, %c0_8] : memref<1x1x6x2xf32, #tpu.memory_space<vmem>>, vector<1x1x6x2xf32>
    %7 = vector.shape_cast %6 : vector<1x1x6x2xf32> to vector<6x2xf32>
    %8 = vector.shape_cast %5 : vector<6x2xf32> to vector<1x1x6x2xf32>
    tpu.vector_store %arg5[%c0_5, %c0_6, %c0_7, %c0_8], %8 {strides = array<i32>} : memref<1x1x6x2xf32, #tpu.memory_space<vmem>>, vector<1x1x6x2xf32>,
    %9 = vector.extract_strided_slice %4 {offsets = [0, 2], sizes = [6, 2], strides = [1, 1]} : vector<6x6xf32> to vector<6x2xf32>
    %c0_9 = arith.constant 0 : index
    %c0_10 = arith.constant 0 : index
    %c0_11 = arith.constant 0 : index
    %c0_12 = arith.constant 0 : index
    %10 = vector.load %arg6[%c0_9, %c0_10, %c0_11, %c0_12] : memref<1x1x6x2xf32, #tpu.memory_space<vmem>>, vector<1x1x6x2xf32>
    %11 = vector.shape_cast %10 : vector<1x1x6x2xf32> to vector<6x2xf32>
    %12 = vector.shape_cast %9 : vector<6x2xf32> to vector<1x1x6x2xf32>
    tpu.vector_store %arg6[%c0_9, %c0_10, %c0_11, %c0_12], %12 {strides = array<i32>} : memref<1x1x6x2xf32, #tpu.memory_space<vmem>>, vector<1x1x6x2xf32>,
    %13 = vector.extract_strided_slice %4 {offsets = [0, 4], sizes = [6, 2], strides = [1, 1]} : vector<6x6xf32> to vector<6x2xf32>
    %c0_13 = arith.constant 0 : index
    %c0_14 = arith.constant 0 : index
    %c0_15 = arith.constant 0 : index
    %c0_16 = arith.constant 0 : index
    %14 = vector.load %arg7[%c0_13, %c0_14, %c0_15, %c0_16] : memref<1x1x6x2xf32, #tpu.memory_space<vmem>>, vector<1x1x6x2xf32>
    %15 = vector.shape_cast %14 : vector<1x1x6x2xf32> to vector<6x2xf32>
    %16 = vector.shape_cast %13 : vector<6x2xf32> to vector<1x1x6x2xf32>
    tpu.vector_store %arg7[%c0_13, %c0_14, %c0_15, %c0_16], %16 {strides = array<i32>} : memref<1x1x6x2xf32, #tpu.memory_space<vmem>>, vector<1x1x6x2xf32>,
    return
  }
  func.func @transform_0(%arg0: i32, %arg1: i32, %arg2: i32) -> (i32, i32, i32) {
    %c0_i32 = arith.constant 0 : i32
    %c0_i32_0 = arith.constant 0 : i32
    return %arg0, %arg1, %c0_i32 : i32, i32, i32
  }
  func.func @transform_1(%arg0: i32, %arg1: i32, %arg2: i32) -> (i32, i32, i32) {
    %c0_i32 = arith.constant 0 : i32
    %c0_i32_0 = arith.constant 0 : i32
    %c0_i32_1 = arith.constant 0 : i32
    return %arg2, %c0_i32, %c0_i32_0 : i32, i32, i32
  }
  func.func @transform_2(%arg0: i32, %arg1: i32, %arg2: i32) -> (i32, i32, i32, i32) {
    %c0_i32 = arith.constant 0 : i32
    %c0_i32_0 = arith.constant 0 : i32
    return %arg0, %arg2, %arg1, %c0_i32 : i32, i32, i32, i32
  }
  func.func @transform_3(%arg0: i32, %arg1: i32, %arg2: i32) -> (i32, i32, i32, i32) {
    %c0_i32 = arith.constant 0 : i32
    %c0_i32_0 = arith.constant 0 : i32
    return %arg0, %arg2, %arg1, %c0_i32 : i32, i32, i32, i32
  }
  func.func @transform_4(%arg0: i32, %arg1: i32, %arg2: i32) -> (i32, i32, i32, i32) {
    %c0_i32 = arith.constant 0 : i32
    %c0_i32_0 = arith.constant 0 : i32
    return %arg0, %arg2, %arg1, %c0_i32 : i32, i32, i32, i32
  }
}

</mosaic_0001>

<bundles_post_ra>
// kernel: tpu_custom_call.1
= control target key start
LH: loop header
LB: loop body
LE: loop exit
PB: predicated region body
PF: predicated region fallthrough
CT: control target
= control target key end

     0   :  { %s765_s15 = smov 0   ;;  %s767_s16 = smov 0   ;;  %s825_s0 = inlined_call_operand.vmem [shape: f32[2,6,3], index: 0, kind: input, shape index: {}]   ;;  %s826_s1 = inlined_call_operand.vmem [shape: f32[2,3,6], index: 1, kind: input, shape index: {}]   ;;  %s827_s2 = inlined_call_operand.vmem [shape: f32[2,2,6,2], index: 2, kind: output, shape index: {0}]   ;;  %s828_s3 = inlined_call_operand.vmem [shape: f32[2,2,6,2], index: 3, kind: output, shape index: {1}]   ;;  %s829_s4 = inlined_call_operand.vmem [shape: f32[2,2,6,2], index: 4, kind: output, shape index: {2}]  }
   0x1   :  { %s769_s17 = smov 0   ;;  %s771_s18 = smov 0  }
   0x2   :  { %s773_s19 = smov 0  }
   0x3 LB: > { %s27_s20 = sadd.s32 1, %s726_s17  ;;  %s34_s21 = sadd.s32 1, %s730_s18  ;;  %s734_s19 = sphi %s773_s19, %s15_s19   ;;  %s730_s18 = sphi %s771_s18, %s833_s18   ;;  %s726_s17 = sphi %s769_s17, %s832_s17   ;;  %s722_s16 = sphi %s767_s16, %s831_s16   ;;  %s718_s15 = sphi %s765_s15, %s830_s15  }
   0x4   : > { %p28_p0 = scmp.ge.s32.totalorder %s27_s20, 2  ;;  %p632_p1 = scmp.ge.s32.totalorder %s734_s19, 1 }
   0x5   : > { %p211_p2 = scmp.lt.s32.totalorder %s734_s19, 5 }
   0x6   : > { %s835_s20 = smov (%p28_p0, %s27_s20), 0  ;;  %s837_s21 = smov (!%p28_p0, %s34_s21), %s730_s18 }
   0x7   : > { %p212_p3 = pnand %p632_p1, %p211_p2  ;;  %p36_p4 = scmp.ge.s32.totalorder %s837_s21, 2 }
   0x8   : > { %p278_p5 = scmp.lt.s32.totalorder (!%p212_p3), %s718_s15, 1  ;;  %p271_p6 = scmp.lt.s32.totalorder (!%p212_p3), %s722_s16, 1  ;;  %v736_v0 = vmov (!%p212_p3), 0.0   ;;  %vm737_vm0 = vmmov (!%p212_p3), 0   ;;  %vm321_vm1 = vcmask (!%p212_p3), 1042432   ;;  %vm317_vm2 = vcmask (!%p212_p3), 23552  }
   0x9   : > { %s839_s21 = smov (%p36_p4, %s837_s21), 0  ;;  %215 = sbr.rel (%p212_p3) target bundleno = 353 (0x161), region = 28 }
   0xa   : > { %647 = vmatprep.subr.mxu0 (!%p212_p3), %v736_v0  ;;  %649 = vmatprep.mubr.msk.f32.mxu0 (!%p212_p3), %vm737_vm0, %v736_v0  ;;  %vm395_vm3 = vcmask (!%p212_p3), 13312   ;;  %s738_s10 = smov (!%p212_p3), 126   ;;  %s739_s11 = smov (!%p212_p3), 124  }
  0x10   : > { %s841_s15 = smov (!%p278_p5, %s718_s15), 1  ;;  %s843_s16 = smov (!%p271_p6, %s722_s16), 1 }
  0x11   : > { %s634_s22 = sshll.u32 %s841_s15, 2  ;;  %s633_s26 = sshll.u32 %s843_s16, 3 }
  0x12   : > { %s281_s25 = scalar_lea.vmem %s826_s1, %s634_s22  ;;  %s277_s29 = scalar_lea.vmem %s825_s0, %s633_s26 }
  0x13   : > { %v316_v1 = vld [vmem:[%s281_s25] sm:$0x7]  ;;  %s635_s30 = sshll.u32 %s843_s16, 1 }
  0x14   : > { %648 = vmatpush3.msk.msra.mxu0 %vm321_vm1, %v316_v1  ;;  %v315_v2 = vld [vmem:[%s277_s29] sm:$0x3f]  ;;  %s290_s5 = sadd.s32 %s635_s30, %s841_s15 }
  0x15   : > { %650 = vmatmul.mubr.msk.f32.vlgmr.msra.gmra.mrb[0].mxu0 %vm317_vm2, %v315_v2  ;;  %s636_s6 = sshll.u32 %s290_s5, 3 }
  0x16   : > { %s292_s9 = scalar_lea.vmem %s827_s2, %s636_s6  ;;  %s303_s14 = scalar_lea.vmem %s828_s3, %s636_s6 }
  0x17   : > { %s314_s22 = scalar_lea.vmem %s829_s4, %s636_s6 }
  0xe8   : > { %v391_v3 = vpop.f32.mrb[0].mxu0 }
  0xe9   : > { %396 = vst.msk [vmem:[%s292_s9] sm:$0x3f] %vm395_vm3, %v391_v3  ;;  %398 = vrot.lane.b32.xlu0 %v391_v3, %s738_s10  ;;  %v651_v4 = vpop.f32.mrb[1].mxu0 }
  0xed   : > { %402 = vrot.lane.b32.xlu0 %v391_v3, %s739_s11 }
 0x15b   : > { %v399_v5 = vpop.permute.xlu0 %398 }
 0x15c   : > { %401 = vst.msk [vmem:[%s303_s14] sm:$0x3f] %vm395_vm3, %v399_v5 }
 0x15f   : > { %v403_v6 = vpop.permute.xlu0 %402 }
 0x160   : > { %405 = vst.msk [vmem:[%s314_s22] sm:$0x3f] %vm395_vm3, %v403_v6 }
 0x161 PF: > { %s15_s19 = sadd.s32 1, %s734_s19   ;;  %s830_s15 = smov %s726_s17 }
 0x162   : > { %p12_p7 = scmp.ge.s32.totalorder %s15_s19, 6   ;;  %s831_s16 = smov %s730_s18 }
 0x163   : > { %s832_s17 = smov %s835_s20  ;;  %s833_s18 = smov %s839_s21 }
 0x164   :  { %14 = sbr.rel (!%p12_p7) target bundleno = 3 (0x3), region = 85 }

</bundles_post_ra>
